<compile_context>
chip_gen: v5e
topology: v5e:2x2
jax: 0.10.0
libtpu: 0.0.40
codegen_flags: <defaults>
</compile_context>

<pallas_src>
import functools

import jax
import jax.numpy as jnp
from jax.experimental import pallas as pl
from jax.experimental.pallas import tpu as pltpu


def _bigrams_fused_kernel(x_ref, w1_ref, b1_ref, w2_ref, b2_ref,
                          ind1_ref, ind2_ref, o_ref):
    """One batch tile of the fused BigramsPredictor forward.

    x_ref   : (Bt, H)    flattened IO embedding tile
    w1_ref  : (H, D)     latent_encoder weight            (resident across the grid)
    b1_ref  : (1, D)     latent_encoder bias
    w2_ref  : (D, GKp)   q_predictor weight, GK padded to a multiple of 128
    b2_ref  : (1, GKp)   q_predictor bias (pad columns = -1e9)
    ind1_ref: (GKp, Gp)  0/1 column->group indicator (segment sum)
    ind2_ref: (Gp, GKp)  0/1 group->column indicator (broadcast back)
    o_ref   : (Bt, GKp)  per-group log-softmax'd logits (lane-dense)
    """
    # latent_encoder: Linear + ReLU, once per batch tile (MXU + VPU).
    h = jnp.dot(x_ref[...], w1_ref[...], preferred_element_type=jnp.float32)
    h = jnp.maximum(h + b1_ref[...], 0.0)                                   # (Bt, D)

    # q_predictor: one wide, lane-dense matmul over all (parent, arg, prim) columns.
    logits = jnp.dot(h, w2_ref[...], preferred_element_type=jnp.float32)
    logits = logits + b2_ref[...]                                           # (Bt, GKp)

    # Per-group (K-wide) log-softmax via a two-stage segment reduction:
    #   stabilize with the global row max (log-softmax is invariant to a per-group
    #   constant shift; the row max is one such constant), per-group sum-of-exp with a
    #   (GKp, Gp) indicator matmul, log on the small (Bt, Gp) tensor, broadcast back
    #   with the (Gp, GKp) indicator matmul.
    row_max = jnp.max(logits, axis=-1, keepdims=True)                       # (Bt, 1)
    z = logits - row_max
    e = jnp.exp(z)                                                          # (Bt, GKp)

    group_sum = jnp.dot(e, ind1_ref[...], preferred_element_type=jnp.float32)   # (Bt, Gp)
    # Floor guards exp-underflow of an entire group so the output stays finite.
    group_sum = jnp.maximum(group_sum, 1e-37)
    neg_log = -jnp.log(group_sum)                                           # (Bt, Gp)

    o_ref[...] = z + jnp.dot(neg_log, ind2_ref[...],
                             preferred_element_type=jnp.float32)            # (Bt, GKp)


def _round_up(n: int, m: int) -> int:
    return ((n + m - 1) // m) * m


@functools.partial(jax.jit, static_argnames=("num_parents", "max_args", "num_prims"))
def bigrams_forward(batch_IOs, w1, b1, w2, b2, *, num_parents, max_args, num_prims):
    B = batch_IOs.shape[0]
    H = batch_IOs.shape[1] * batch_IOs.shape[2]
    D = w1.shape[1]
    P, A, K = num_parents, max_args, num_prims
    GK = P * A * K

    # Lane-dense padding of the grouped/output axis (544 -> 640 here). Pad columns get a
    # -1e9 bias so exp underflows to 0 exactly and they cannot perturb any real group.
    GKp = _round_up(GK, 128)
    Gp = -(-GKp // K)                      # ceil(GKp / K); column c belongs to group c // K

    # IOEmbedder (synthetic): flatten to (B, H).
    x = batch_IOs.reshape(B, H).astype(jnp.float32)

    # Batch tile: sublane-aligned, capped so per-tile VMEM stays small at large B.
    Bt = min(256, _round_up(B, 8))
    Bp = _round_up(B, Bt)
    if Bp != B:
        x = jnp.pad(x, ((0, Bp - B), (0, 0)))

    w1f = w1.astype(jnp.float32)
    b1_2d = b1.reshape(1, D).astype(jnp.float32)
    w2p = jnp.pad(w2.astype(jnp.float32), ((0, 0), (0, GKp - GK)))
    b2p = jnp.pad(b2.reshape(1, GK).astype(jnp.float32),
                  ((0, 0), (0, GKp - GK)), constant_values=-1e9)

    # Precomputed 0/1 segment indicators (built once per trace, outside the kernel).
    col_group = jnp.arange(GKp, dtype=jnp.int32) // K                      # (GKp,)
    groups = jnp.arange(Gp, dtype=jnp.int32)                               # (Gp,)
    ind1 = (col_group[:, None] == groups[None, :]).astype(jnp.float32)     # (GKp, Gp)
    ind2 = ind1.T                                                          # (Gp, GKp)

    out = pl.pallas_call(
        _bigrams_fused_kernel,
        out_shape=jax.ShapeDtypeStruct((Bp, GKp), jnp.float32),
        grid=(Bp // Bt,),
        in_specs=[
            pl.BlockSpec((Bt, H), lambda i: (i, 0)),    # x tile, pipelined over the grid
            pl.BlockSpec((H, D), lambda i: (0, 0)),     # weights / biases / indicators
            pl.BlockSpec((1, D), lambda i: (0, 0)),     #   stay resident (constant block)
            pl.BlockSpec((D, GKp), lambda i: (0, 0)),
            pl.BlockSpec((1, GKp), lambda i: (0, 0)),
            pl.BlockSpec((GKp, Gp), lambda i: (0, 0)),
            pl.BlockSpec((Gp, GKp), lambda i: (0, 0)),
        ],
        out_specs=pl.BlockSpec((Bt, GKp), lambda i: (i, 0)),
        compiler_params=pltpu.CompilerParams(dimension_semantics=("parallel",)),
    )(x, w1f, b1_2d, w2p, b2p, ind1, ind2)

    # Drop batch/column padding; row-major (B, GK) -> (B, P, A, K) == torch .view(...).
    return out[:B, :GK].reshape(B, P, A, K)


def _reference_forward(batch_IOs, w1, b1, w2, b2, num_parents, max_args, num_prims):
    B = batch_IOs.shape[0]
    x = batch_IOs.reshape(B, -1)
    h = jnp.maximum(x @ w1 + b1, 0.0)
    logits = (h @ w2 + b2).reshape(B, num_parents, max_args, num_prims)
    return jax.nn.log_softmax(logits, axis=-1)


if __name__ == "__main__":
    # Small shapes consistent with the module:
    #   B = batch, enc_dim = IOEncoder.output_dimension, emb_dim = IOEmbedder.output_dimension
    B, enc_dim, emb_dim = 2, 8, 16
    H = enc_dim * emb_dim            # 128
    D = 64                           # latent_encoder output_size (guess_output_size)
    num_prims = 16                   # number_of_primitives
    num_parents = num_prims + 1      # number_of_parents = primitives + 1
    max_args = 2                     # maximum_arguments
    out_features = num_parents * max_args * num_prims   # 544

    key = jax.random.PRNGKey(0)
    k_x, k_w1, k_b1, k_w2, k_b2 = jax.random.split(key, 5)

    batch_IOs = jax.random.normal(k_x, (B, enc_dim, emb_dim), dtype=jnp.float32)

    # Deterministic synthetic parameters (torch-Linear-style uniform init bounds).
    lim1 = 1.0 / jnp.sqrt(jnp.float32(H))
    lim2 = 1.0 / jnp.sqrt(jnp.float32(D))
    w1 = jax.random.uniform(k_w1, (H, D), jnp.float32, -lim1, lim1)
    b1 = jax.random.uniform(k_b1, (D,), jnp.float32, -lim1, lim1)
    w2 = jax.random.uniform(k_w2, (D, out_features), jnp.float32, -lim2, lim2)
    b2 = jax.random.uniform(k_b2, (out_features,), jnp.float32, -lim2, lim2)

    out = bigrams_forward(
        batch_IOs, w1, b1, w2, b2,
        num_parents=num_parents, max_args=max_args, num_prims=num_prims)
    out = jax.block_until_ready(out)

    ref = _reference_forward(batch_IOs, w1, b1, w2, b2,
                             num_parents, max_args, num_prims)

    assert out.shape == (B, num_parents, max_args, num_prims), out.shape
    assert bool(jnp.all(jnp.isfinite(out)))
    assert jnp.allclose(out, ref, atol=1e-4, rtol=1e-4), \
        float(jnp.max(jnp.abs(out - ref)))
    # Each K-slice is a valid log-probability distribution.
    assert jnp.allclose(jnp.sum(jnp.exp(out), axis=-1), 1.0, atol=1e-3)

    print("KERNEL_OK")
</pallas_src>

<mosaic_0001>
module attributes {stable_mosaic.version = 11 : i64} {
  func.func @_bigrams_fused_kernel(%arg0: i32, %arg1: memref<8x128xf32, #tpu.memory_space<vmem>>, %arg2: memref<128x64xf32, #tpu.memory_space<vmem>>, %arg3: memref<1x64xf32, #tpu.memory_space<vmem>>, %arg4: memref<64x640xf32, #tpu.memory_space<vmem>>, %arg5: memref<1x640xf32, #tpu.memory_space<vmem>>, %arg6: memref<640x40xf32, #tpu.memory_space<vmem>>, %arg7: memref<40x640xf32, #tpu.memory_space<vmem>>, %arg8: memref<8x640xf32, #tpu.memory_space<vmem>>) attributes {dimension_semantics = [#tpu.dimension_semantics<parallel>], iteration_bounds = array<i64: 1>, scalar_prefetch = 0 : i64, scratch_operands = 0 : i64, tpu.core_type = #tpu.core_type<tc>, window_params = [{transform_indices = @transform_0, window_bounds = array<i64: 8, 128>}, {pipeline_mode = #tpu.pipeline_mode<synchronous>, transform_indices = @transform_1, window_bounds = array<i64: 128, 64>}, {pipeline_mode = #tpu.pipeline_mode<synchronous>, transform_indices = @transform_2, window_bounds = array<i64: 1, 64>}, {pipeline_mode = #tpu.pipeline_mode<synchronous>, transform_indices = @transform_3, window_bounds = array<i64: 64, 640>}, {pipeline_mode = #tpu.pipeline_mode<synchronous>, transform_indices = @transform_4, window_bounds = array<i64: 1, 640>}, {pipeline_mode = #tpu.pipeline_mode<synchronous>, transform_indices = @transform_5, window_bounds = array<i64: 640, 40>}, {pipeline_mode = #tpu.pipeline_mode<synchronous>, transform_indices = @transform_6, window_bounds = array<i64: 40, 640>}, {transform_indices = @transform_7, window_bounds = array<i64: 8, 640>}]} {
    %c0 = arith.constant 0 : index
    %c0_0 = arith.constant 0 : index
    %0 = vector.load %arg1[%c0, %c0_0] : memref<8x128xf32, #tpu.memory_space<vmem>>, vector<8x128xf32>
    %c0_1 = arith.constant 0 : index
    %c0_2 = arith.constant 0 : index
    %1 = vector.load %arg2[%c0_1, %c0_2] : memref<128x64xf32, #tpu.memory_space<vmem>>, vector<128x64xf32>
    %cst = arith.constant dense<0.000000e+00> : vector<8x64xf32>
    %2 = tpu.matmul %0, %1, %cst {dimension_numbers = #tpu.dot_dimension_numbers<[1], [0], [0], [1], [0, 0, 1, 1], [], []>} : vector<8x128xf32>, vector<128x64xf32>, vector<8x64xf32> -> vector<8x64xf32>
    %c0_3 = arith.constant 0 : index
    %c0_4 = arith.constant 0 : index
    %3 = vector.load %arg3[%c0_3, %c0_4] : memref<1x64xf32, #tpu.memory_space<vmem>>, vector<1x64xf32>
    %4 = vector.broadcast %3 : vector<1x64xf32> to vector<8x64xf32>
    %5 = arith.addf %2, %4 : vector<8x64xf32>
    %cst_5 = arith.constant 0.000000e+00 : f32
    %6 = vector.broadcast %cst_5 : f32 to vector<8x64xf32>
    %7 = arith.maximumf %5, %6 : vector<8x64xf32>
    %c0_6 = arith.constant 0 : index
    %c0_7 = arith.constant 0 : index
    %8 = vector.load %arg4[%c0_6, %c0_7] : memref<64x640xf32, #tpu.memory_space<vmem>>, vector<64x640xf32>
    %cst_8 = arith.constant dense<0.000000e+00> : vector<8x640xf32>
    %9 = tpu.matmul %7, %8, %cst_8 {dimension_numbers = #tpu.dot_dimension_numbers<[1], [0], [0], [1], [0, 0, 1, 1], [], []>} : vector<8x64xf32>, vector<64x640xf32>, vector<8x640xf32> -> vector<8x640xf32>
    %c0_9 = arith.constant 0 : index
    %c0_10 = arith.constant 0 : index
    %10 = vector.load %arg5[%c0_9, %c0_10] : memref<1x640xf32, #tpu.memory_space<vmem>>, vector<1x640xf32>
    %11 = vector.broadcast %10 : vector<1x640xf32> to vector<8x640xf32>
    %12 = arith.addf %9, %11 : vector<8x640xf32>
    %cst_11 = arith.constant dense<0xFF800000> : vector<8xf32>
    %13 = vector.multi_reduction <maximumf>, %12, %cst_11 [1] : vector<8x640xf32> to vector<8xf32>
    %14 = vector.shape_cast %13 : vector<8xf32> to vector<8x1xf32>
    %15 = vector.broadcast %14 : vector<8x1xf32> to vector<8x640xf32>
    %16 = arith.subf %12, %15 : vector<8x640xf32>
    %17 = math.exp %16 : vector<8x640xf32>
    %c0_12 = arith.constant 0 : index
    %c0_13 = arith.constant 0 : index
    %18 = vector.load %arg6[%c0_12, %c0_13] : memref<640x40xf32, #tpu.memory_space<vmem>>, vector<640x40xf32>
    %cst_14 = arith.constant dense<0.000000e+00> : vector<8x40xf32>
    %19 = tpu.matmul %17, %18, %cst_14 {dimension_numbers = #tpu.dot_dimension_numbers<[1], [0], [0], [1], [0, 0, 1, 1], [], []>} : vector<8x640xf32>, vector<640x40xf32>, vector<8x40xf32> -> vector<8x40xf32>
    %cst_15 = arith.constant 9.99999991E-38 : f32
    %20 = vector.broadcast %cst_15 : f32 to vector<8x40xf32>
    %21 = arith.maximumf %19, %20 : vector<8x40xf32>
    %22 = math.log %21 : vector<8x40xf32>
    %cst_16 = arith.constant 0.000000e+00 : f32
    %23 = vector.broadcast %cst_16 : f32 to vector<8x40xf32>
    %24 = arith.subf %23, %22 : vector<8x40xf32>
    %c0_17 = arith.constant 0 : index
    %c0_18 = arith.constant 0 : index
    %25 = vector.load %arg7[%c0_17, %c0_18] : memref<40x640xf32, #tpu.memory_space<vmem>>, vector<40x640xf32>
    %cst_19 = arith.constant dense<0.000000e+00> : vector<8x640xf32>
    %26 = tpu.matmul %24, %25, %cst_19 {dimension_numbers = #tpu.dot_dimension_numbers<[1], [0], [0], [1], [0, 0, 1, 1], [], []>} : vector<8x40xf32>, vector<40x640xf32>, vector<8x640xf32> -> vector<8x640xf32>
    %27 = arith.addf %16, %26 : vector<8x640xf32>
    %c0_20 = arith.constant 0 : index
    %c0_21 = arith.constant 0 : index
    %28 = vector.load %arg8[%c0_20, %c0_21] : memref<8x640xf32, #tpu.memory_space<vmem>>, vector<8x640xf32>
    tpu.vector_store %arg8[%c0_20, %c0_21], %27 {strides = array<i32>} : memref<8x640xf32, #tpu.memory_space<vmem>>, vector<8x640xf32>,
    return
  }
  func.func @transform_0(%arg0: i32) -> (i32, i32) {
    %c0_i32 = arith.constant 0 : i32
    %c0_i32_0 = arith.constant 0 : i32
    return %arg0, %c0_i32 : i32, i32
  }
  func.func @transform_1(%arg0: i32) -> (i32, i32) {
    %c0_i32 = arith.constant 0 : i32
    %c0_i32_0 = arith.constant 0 : i32
    %c0_i32_1 = arith.constant 0 : i32
    return %c0_i32, %c0_i32_0 : i32, i32
  }
  func.func @transform_2(%arg0: i32) -> (i32, i32) {
    %c0_i32 = arith.constant 0 : i32
    %c0_i32_0 = arith.constant 0 : i32
    %c0_i32_1 = arith.constant 0 : i32
    return %c0_i32, %c0_i32_0 : i32, i32
  }
  func.func @transform_3(%arg0: i32) -> (i32, i32) {
    %c0_i32 = arith.constant 0 : i32
    %c0_i32_0 = arith.constant 0 : i32
    %c0_i32_1 = arith.constant 0 : i32
    return %c0_i32, %c0_i32_0 : i32, i32
  }
  func.func @transform_4(%arg0: i32) -> (i32, i32) {
    %c0_i32 = arith.constant 0 : i32
    %c0_i32_0 = arith.constant 0 : i32
    %c0_i32_1 = arith.constant 0 : i32
    return %c0_i32, %c0_i32_0 : i32, i32
  }
  func.func @transform_5(%arg0: i32) -> (i32, i32) {
    %c0_i32 = arith.constant 0 : i32
    %c0_i32_0 = arith.constant 0 : i32
    %c0_i32_1 = arith.constant 0 : i32
    return %c0_i32, %c0_i32_0 : i32, i32
  }
  func.func @transform_6(%arg0: i32) -> (i32, i32) {
    %c0_i32 = arith.constant 0 : i32
    %c0_i32_0 = arith.constant 0 : i32
    %c0_i32_1 = arith.constant 0 : i32
    return %c0_i32, %c0_i32_0 : i32, i32
  }
  func.func @transform_7(%arg0: i32) -> (i32, i32) {
    %c0_i32 = arith.constant 0 : i32
    %c0_i32_0 = arith.constant 0 : i32
    return %arg0, %c0_i32 : i32, i32
  }
}

</mosaic_0001>

<bundles_post_ra>
// kernel: bigrams_forward.1
= control target key start
LH: loop header
LB: loop body
LE: loop exit
PB: predicated region body
PF: predicated region fallthrough
CT: control target
= control target key end

     0   :  { %vm120_vm0 = vcmask 523264   ;;  %vm454_vm1 = vcmask 326656   ;;  %s1182_s1 = inlined_call_operand.vmem [shape: f32[128,64], index: 1, kind: input, shape index: {}]   ;;  %s1183_s3 = inlined_call_operand.vmem [shape: f32[64,640], index: 3, kind: input, shape index: {}]   ;;  %s1184_s2 = inlined_call_operand.vmem [shape: f32[1,64], index: 2, kind: input, shape index: {}]   ;;  %s1185_s0 = inlined_call_operand.vmem [shape: f32[8,128], index: 0, kind: input, shape index: {}]   ;;  %s1186_s5 = inlined_call_operand.vmem [shape: f32[640,40], index: 5, kind: input, shape index: {}]   ;;  %s1187_s4 = inlined_call_operand.vmem [shape: f32[1,640], index: 4, kind: input, shape index: {}]   ;;  %s1188_s6 = inlined_call_operand.vmem [shape: f32[40,640], index: 6, kind: input, shape index: {}]   ;;  %s1189_s7 = inlined_call_operand.vmem [shape: f32[8,640], index: 7, kind: output, shape index: {}]  }
   0x1   :  { %v42_v0 = vld [vmem:[%s1182_s1 + $0x78] sm:$0xff]  ;;  %v41_v1 = vld [vmem:[%s1182_s1 + $0x70] sm:$0xff]  ;;  %v40_v2 = vld [vmem:[%s1182_s1 + $0x68] sm:$0xff] }
   0x2   :  { %47 = vmatpush.msra.mxu0 %v42_v0  ;;  %v39_v3 = vld [vmem:[%s1182_s1 + $0x60] sm:$0xff]  ;;  %v38_v4 = vld [vmem:[%s1182_s1 + $0x58] sm:$0xff]  ;;  %v98_v7 = vld [vmem:[%s1183_s3 + $0xf0] sm:$0xff] }
   0x3   :  { %v103_v5 = vld [vmem:[%s1183_s3 + $0x118] sm:$0xff]  ;;  %v104_v6 = vld [vmem:[%s1183_s3 + $0x120] sm:$0xff]  ;;  %v93_v9 = vld [vmem:[%s1183_s3 + $0xc8] sm:$0xff] }
   0x4   :  { %48 = vmatpush.msra.mxu0 %v41_v1  ;;  %132 = vmatpush.msra.mxu1 %v103_v5  ;;  %v99_v8 = vld [vmem:[%s1183_s3 + $0xf8] sm:$0xff]  ;;  %v37_v10 = vld [vmem:[%s1182_s1 + $0x50] sm:$0xff]  ;;  %v105_v12 = vld [vmem:[%s1183_s3 + $0x128] sm:$0xff] }
   0x5   :  { %152 = vmatpush.msra.mxu2 %v104_v6  ;;  %v94_v11 = vld [vmem:[%s1183_s3 + $0xd0] sm:$0xff]  ;;  %v88_v13 = vld [vmem:[%s1183_s3 + $0xa0] sm:$0xff]  ;;  %v36_v15 = vld [vmem:[%s1182_s1 + $0x48] sm:$0xff]  ;;  %172 = vmatpush.msra.mxu3 %v105_v12 }
   0x6   :  { %49 = vmatpush.msra.mxu0 %v40_v2  ;;  %133 = vmatpush.msra.mxu1 %v98_v7  ;;  %v100_v14 = vld [vmem:[%s1183_s3 + $0x100] sm:$0xff]  ;;  %v89_v16 = vld [vmem:[%s1183_s3 + $0xa8] sm:$0xff]  ;;  %v83_v17 = vld [vmem:[%s1183_s3 + $0x78] sm:$0xff] }
   0x7   :  { %153 = vmatpush.msra.mxu2 %v99_v8  ;;  %v95_v18 = vld [vmem:[%s1183_s3 + $0xd8] sm:$0xff]  ;;  %v35_v19 = vld [vmem:[%s1182_s1 + $0x40] sm:$0xff]  ;;  %173 = vmatpush.msra.mxu3 %v100_v14  ;;  %v78_v21 = vld [vmem:[%s1183_s3 + $0x50] sm:$0xff] }
   0x8   :  { %50 = vmatpush.msra.mxu0 %v39_v3  ;;  %134 = vmatpush.msra.mxu1 %v93_v9  ;;  %v84_v20 = vld [vmem:[%s1183_s3 + $0x80] sm:$0xff]  ;;  %v90_v22 = vld [vmem:[%s1183_s3 + $0xb0] sm:$0xff]  ;;  %v34_v23 = vld [vmem:[%s1182_s1 + $0x38] sm:$0xff] }
   0x9   :  { %154 = vmatpush.msra.mxu2 %v94_v11  ;;  %v79_v24 = vld [vmem:[%s1183_s3 + $0x58] sm:$0xff]  ;;  %174 = vmatpush.msra.mxu3 %v95_v18  ;;  %v73_v25 = vld [vmem:[%s1183_s3 + $0x28] sm:$0xff]  ;;  %v33_v27 = vld [vmem:[%s1182_s1 + $0x30] sm:$0xff] }
   0xa   :  { %51 = vmatpush.msra.mxu0 %v38_v4  ;;  %135 = vmatpush.msra.mxu1 %v88_v13  ;;  %v85_v26 = vld [vmem:[%s1183_s3 + $0x88] sm:$0xff]  ;;  %v74_v28 = vld [vmem:[%s1183_s3 + $0x30] sm:$0xff]  ;;  %v68_v29 = vld [vmem:[%s1183_s3] sm:$0xff] }
   0xb   :  { %155 = vmatpush.msra.mxu2 %v89_v16  ;;  %175 = vmatpush.msra.mxu3 %v90_v22  ;;  %v32_v30 = vld [vmem:[%s1182_s1 + $0x28] sm:$0xff]  ;;  %v106_v32 = vld [vmem:[%s1183_s3 + $0x130] sm:$0xff]  ;;  %v107_v33 = vld [vmem:[%s1183_s3 + $0x138] sm:$0xff] }
   0xc   :  { %52 = vmatpush.msra.mxu0 %v37_v10  ;;  %136 = vmatpush.msra.mxu1 %v83_v17  ;;  %v69_v31 = vld [vmem:[%s1183_s3 + $0x8] sm:$0xff]  ;;  %v31_v34 = vld [vmem:[%s1182_s1 + $0x20] sm:$0xff]  ;;  %v30_v35 = vld [vmem:[%s1182_s1 + $0x18] sm:$0xff] }
   0xd   :  { %156 = vmatpush.msra.mxu2 %v84_v20  ;;  %176 = vmatpush.msra.mxu3 %v85_v26  ;;  %v29_v36 = vld [vmem:[%s1182_s1 + $0x10] sm:$0xff]  ;;  %v28_v37 = vld [vmem:[%s1182_s1 + $0x8] sm:$0xff]  ;;  %v27_v38 = vld [vmem:[%s1182_s1] sm:$0xff] }
   0xe   :  { %53 = vmatpush.msra.mxu0 %v36_v15  ;;  %137 = vmatpush.msra.mxu1 %v78_v21  ;;  %v26_v39 = vld [vmem:[%s1185_s0] sm:$0xff]  ;;  %v101_v41 = vld [vmem:[%s1183_s3 + $0x108] sm:$0xff]  ;;  %v102_v42 = vld [vmem:[%s1183_s3 + $0x110] sm:$0xff] }
   0xf   :  { %157 = vmatpush.msra.mxu2 %v79_v24  ;;  %v80_v40 = vld [vmem:[%s1183_s3 + $0x60] sm:$0xff]  ;;  %v75_v43 = vld [vmem:[%s1183_s3 + $0x38] sm:$0xff]  ;;  %v97_v45 = vld [vmem:[%s1183_s3 + $0xe8] sm:$0xff] }
  0x10   :  { %54 = vmatpush.msra.mxu0 %v35_v19  ;;  %138 = vmatpush.msra.mxu1 %v73_v25  ;;  %v96_v44 = vld [vmem:[%s1183_s3 + $0xe0] sm:$0xff]  ;;  %v70_v46 = vld [vmem:[%s1183_s3 + $0x10] sm:$0xff]  ;;  %v91_v47 = vld [vmem:[%s1183_s3 + $0xb8] sm:$0xff] }
  0x11   :  { %158 = vmatpush.msra.mxu2 %v74_v28  ;;  %177 = vmatpush.msra.mxu3 %v80_v40  ;;  %v92_v48 = vld [vmem:[%s1183_s3 + $0xc0] sm:$0xff]  ;;  %v86_v49 = vld [vmem:[%s1183_s3 + $0x90] sm:$0xff]  ;;  %v87_v50 = vld [vmem:[%s1183_s3 + $0x98] sm:$0xff] }
  0x12   :  { %55 = vmatpush.msra.mxu0 %v34_v23  ;;  %139 = vmatpush.msra.mxu1 %v68_v29  ;;  %v81_v51 = vld [vmem:[%s1183_s3 + $0x68] sm:$0xff]  ;;  %v82_v52 = vld [vmem:[%s1183_s3 + $0x70] sm:$0xff]  ;;  %v76_v53 = vld [vmem:[%s1183_s3 + $0x40] sm:$0xff] }
  0x13   :  { %159 = vmatpush.msra.mxu2 %v69_v31  ;;  %178 = vmatpush.msra.mxu3 %v75_v43  ;;  %v77_v54 = vld [vmem:[%s1183_s3 + $0x48] sm:$0xff]  ;;  %v71_v55 = vld [vmem:[%s1183_s3 + $0x18] sm:$0xff]  ;;  %v72_v56 = vld [vmem:[%s1183_s3 + $0x20] sm:$0xff] }
  0x14   :  { %56 = vmatpush.msra.mxu0 %v33_v27  ;;  %192 = vmatpush.msrb.mxu1 %v106_v32  ;;  %v582_v57 = vld [vmem:[%s1184_s2] ss:$0 sm:$0xff]  ;;  %v260_v61 = vld [vmem:[%s1186_s5 + $0x78] sm:$0xff]  ;;  %v259_v62 = vld [vmem:[%s1186_s5 + $0x70] sm:$0xff] }
  0x15   :  { %212 = vmatpush.msrb.mxu2 %v107_v33  ;;  %179 = vmatpush.msra.mxu3 %v70_v46  ;;  %v258_v63 = vld [vmem:[%s1186_s5 + $0x68] sm:$0xff]  ;;  %v257_v0 = vld [vmem:[%s1186_s5 + $0x60] sm:$0xff]  ;;  %v276_v1 = vld [vmem:[%s1186_s5 + $0xf8] sm:$0xff] }
  0x16   :  { %57 = vmatpush.msra.mxu0 %v32_v30  ;;  %193 = vmatpush.msrb.mxu1 %v101_v41  ;;  %v292_v2 = vld [vmem:[%s1186_s5 + $0x178] sm:$0xff]  ;;  %v275_v4 = vld [vmem:[%s1186_s5 + $0xf0] sm:$0xff]  ;;  %v274_v8 = vld [vmem:[%s1186_s5 + $0xe8] sm:$0xff] }
  0x17   :  { %213 = vmatpush.msrb.mxu2 %v102_v42  ;;  %325 = vmatpush.msrb.mxu3 %v260_v61  ;;  %v308_v3 = vld [vmem:[%s1186_s5 + $0x1f8] sm:$0xff]  ;;  %v291_v5 = vld [vmem:[%s1186_s5 + $0x170] sm:$0xff]  ;;  %v290_v9 = vld [vmem:[%s1186_s5 + $0x168] sm:$0xff] }
  0x18   :  { %58 = vmatpush.msra.mxu0 %v31_v34  ;;  %194 = vmatpush.msrb.mxu1 %v96_v44  ;;  %v256_v6 = vld [vmem:[%s1186_s5 + $0x58] sm:$0xff]  ;;  %v307_v7 = vld [vmem:[%s1186_s5 + $0x1f0] sm:$0xff]  ;;  %v306_v10 = vld [vmem:[%s1186_s5 + $0x1e8] sm:$0xff] }
  0x19   :  { %214 = vmatpush.msrb.mxu2 %v97_v45  ;;  %326 = vmatpush.msrb.mxu3 %v259_v62  ;;  %v255_v11 = vld [vmem:[%s1186_s5 + $0x50] sm:$0xff]  ;;  %v273_v12 = vld [vmem:[%s1186_s5 + $0xe0] sm:$0xff]  ;;  %v254_v15 = vld [vmem:[%s1186_s5 + $0x48] sm:$0xff] }
  0x1a   :  { %59 = vmatpush.msra.mxu0 %v30_v35  ;;  %195 = vmatpush.msrb.mxu1 %v91_v47  ;;  %v289_v13 = vld [vmem:[%s1186_s5 + $0x160] sm:$0xff]  ;;  %v272_v16 = vld [vmem:[%s1186_s5 + $0xd8] sm:$0xff]  ;;  %v271_v21 = vld [vmem:[%s1186_s5 + $0xd0] sm:$0xff] }
  0x1b   :  { %215 = vmatpush.msrb.mxu2 %v92_v48  ;;  %327 = vmatpush.msrb.mxu3 %v258_v63  ;;  %v305_v14 = vld [vmem:[%s1186_s5 + $0x1e0] sm:$0xff]  ;;  %v288_v18 = vld [vmem:[%s1186_s5 + $0x158] sm:$0xff]  ;;  %v287_v22 = vld [vmem:[%s1186_s5 + $0x150] sm:$0xff] }
  0x1c   :  { %60 = vmatpush.msra.mxu0 %v29_v36  ;;  %196 = vmatpush.msrb.mxu1 %v86_v49  ;;  %v304_v19 = vld [vmem:[%s1186_s5 + $0x1d8] sm:$0xff]  ;;  %v253_v20 = vld [vmem:[%s1186_s5 + $0x40] sm:$0xff]  ;;  %v303_v23 = vld [vmem:[%s1186_s5 + $0x1d0] sm:$0xff] }
  0x1d   :  { %216 = vmatpush.msrb.mxu2 %v87_v50  ;;  %328 = vmatpush.msrb.mxu3 %v257_v0  ;;  %v252_v24 = vld [vmem:[%s1186_s5 + $0x38] sm:$0xff]  ;;  %v270_v25 = vld [vmem:[%s1186_s5 + $0xc8] sm:$0xff]  ;;  %v251_v29 = vld [vmem:[%s1186_s5 + $0x30] sm:$0xff] }
  0x1e   :  { %61 = vmatpush.msra.mxu0 %v28_v37  ;;  %197 = vmatpush.msrb.mxu1 %v81_v51  ;;  %v286_v27 = vld [vmem:[%s1186_s5 + $0x148] sm:$0xff]  ;;  %v269_v30 = vld [vmem:[%s1186_s5 + $0xc0] sm:$0xff]  ;;  %v268_v35 = vld [vmem:[%s1186_s5 + $0xb8] sm:$0xff] }
  0x1f   :  { %217 = vmatpush.msrb.mxu2 %v82_v52  ;;  %329 = vmatpush.msrb.mxu3 %v256_v6  ;;  %v302_v28 = vld [vmem:[%s1186_s5 + $0x1c8] sm:$0xff]  ;;  %v108_v31 = vld [vmem:[%s1187_s4] sm:$0x1f]  ;;  %v284_v36 = vld [vmem:[%s1186_s5 + $0x138] sm:$0xff] }
  0x20   :  { %62 = vmatpush.msra.mxu0 %v27_v38  ;;  %198 = vmatpush.msrb.mxu1 %v76_v53  ;;  %v285_v32 = vld [vmem:[%s1186_s5 + $0x140] sm:$0xff]  ;;  %v250_v34 = vld [vmem:[%s1186_s5 + $0x28] sm:$0xff]  ;;  %v300_v37 = vld [vmem:[%s1186_s5 + $0x1b8] sm:$0xff]  ;;  %v110_v38 = vperm.slane %v108_v31, 0  ;;  %v114_v40 = vperm.slane %v108_v31, 4  ;;  %v111_v46 = vperm.slane %v108_v31, 1 }
  0x21   :  { %63 = vmatmul.f32.vlgmr.msra.gmra.mxu0 %v26_v39  ;;  %218 = vmatpush.msrb.mxu2 %v77_v54  ;;  %v301_v33 = vld [vmem:[%s1186_s5 + $0x1c0] sm:$0xff]  ;;  %v113_v39 = vperm.slane %v108_v31, 3  ;;  %v267_v42 = vld [vmem:[%s1186_s5 + $0xb0] sm:$0xff]  ;;  %v112_v47 = vperm.slane %v108_v31, 2  ;;  %v248_v48 = vld [vmem:[%s1186_s5 + $0x18] sm:$0xff] }
  0x22   :  { %199 = vmatpush.msrb.mxu1 %v71_v55  ;;  %345 = vmatpush.msrb.mxu0 %v276_v1  ;;  %v249_v41 = vld [vmem:[%s1186_s5 + $0x20] sm:$0xff]  ;;  %v283_v44 = vld [vmem:[%s1186_s5 + $0x130] sm:$0xff]  ;;  %v324_v62 = vld [vmem:[%s1186_s5 + $0x278] sm:$0xff] }
  0x23   :  { %219 = vmatpush.msrb.mxu2 %v72_v56  ;;  %330 = vmatpush.msrb.mxu3 %v255_v11  ;;  %v299_v45 = vld [vmem:[%s1186_s5 + $0x1b0] sm:$0xff]  ;;  %v245_v61 = vld [vmem:[%s1186_s5] sm:$0xff]  ;;  %v322_v1 = vld [vmem:[%s1186_s5 + $0x268] sm:$0xff] }
  0x24   :  { %346 = vmatpush.msrb.mxu0 %v275_v4  ;;  %v247_v54 = vld [vmem:[%s1186_s5 + $0x10] sm:$0xff]  ;;  %v282_v6 = vld [vmem:[%s1186_s5 + $0x128] sm:$0xff]  ;;  %v297_v11 = vld [vmem:[%s1186_s5 + $0x1a0] sm:$0xff] }
  0x25   :  { %331 = vmatpush.msrb.mxu3 %v254_v15  ;;  %v323_v0 = vld [vmem:[%s1186_s5 + $0x270] sm:$0xff]  ;;  %v296_v15 = vld [vmem:[%s1186_s5 + $0x198] sm:$0xff]  ;;  %v310_v31 = vld [vmem:[%s1186_s5 + $0x208] sm:$0xff] }
  0x26   :  { %347 = vmatpush.msrb.mxu0 %v274_v8  ;;  %v319_v4 = vld [vmem:[%s1186_s5 + $0x250] sm:$0xff]  ;;  %v318_v8 = vld [vmem:[%s1186_s5 + $0x248] sm:$0xff] }
  0x27   :  { %332 = vmatpush.msrb.mxu3 %v253_v20  ;;  %v315_v20 = vld [vmem:[%s1186_s5 + $0x230] sm:$0xff] }
  0x28   :  { %348 = vmatpush.msrb.mxu0 %v273_v12  ;;  %v317_v12 = vld [vmem:[%s1186_s5 + $0x240] sm:$0xff] }
  0x29   :  { %333 = vmatpush.msrb.mxu3 %v252_v24  ;;  %v314_v24 = vld [vmem:[%s1186_s5 + $0x228] sm:$0xff] }
  0x2a   :  { %349 = vmatpush.msrb.mxu0 %v272_v16  ;;  %v316_v16 = vld [vmem:[%s1186_s5 + $0x238] sm:$0xff] }
  0x2b   :  { %334 = vmatpush.msrb.mxu3 %v251_v29  ;;  %v312_v29 = vld [vmem:[%s1186_s5 + $0x218] sm:$0xff] }
  0x2c   :  { %350 = vmatpush.msrb.mxu0 %v271_v21  ;;  %v262_v21 = vld [vmem:[%s1186_s5 + $0x88] sm:$0xff] }
  0x2d   :  { %335 = vmatpush.msrb.mxu3 %v250_v34 }
  0x2e   :  { %351 = vmatpush.msrb.mxu0 %v270_v25  ;;  %v261_v25 = vld [vmem:[%s1186_s5 + $0x80] sm:$0xff] }
  0x2f   :  { %336 = vmatpush.msrb.mxu3 %v249_v41 }
  0x30   :  { %352 = vmatpush.msrb.mxu0 %v269_v30  ;;  %v311_v30 = vld [vmem:[%s1186_s5 + $0x210] sm:$0xff] }
  0x31   :  { %337 = vmatpush.msrb.mxu3 %v248_v48 }
  0x32   :  { %353 = vmatpush.msrb.mxu0 %v268_v35 }
  0x33   :  { %338 = vmatpush.msrb.mxu3 %v247_v54  ;;  %v446_v54 = vld [vmem:[%s1188_s6 + $0x88] sm:$0xff] }
  0x34   :  { %354 = vmatpush.msrb.mxu0 %v267_v42 }
  0x9e   :  { %v64_v58 = vpop.f32.mrf.mxu0 }
  0x9f   :  { %v65_v59 = vadd.f32 %v582_v57, %v64_v58  ;;  %v246_v58 = vld [vmem:[%s1186_s5 + $0x8] sm:$0xff] }
  0xa0   :  { %339 = vmatpush.msrb.mxu3 %v246_v58  ;;  %v434_v58 = vld [vmem:[%s1188_s6 + $0x28] sm:$0xff] }
  0xa1   :  { %v67_v60 = vmax.f32 %v65_v59, 0.0 }
  0xa2   :  { %340 = vmatpush.msrb.mxu3 %v245_v61  ;;  %v429_v61 = vld [vmem:[%s1188_s6] sm:$0xff] }
  0xa3   :  { %572 = vmatmul.msk.f32.vlgmr.msra.gmra.mxu1 %vm120_vm0, %v67_v60  ;;  %573 = vmatmul.msk.f32.vlgmr.msra.gmra.mxu2 %vm120_vm0, %v67_v60 }
  0xa4   :  { %574 = vmatmul.msk.f32.vlgmr.msra.gmra.mxu3 %vm120_vm0, %v67_v60  ;;  %365 = vmatpush.msra.mxu1 %v292_v2  ;;  %v321_v2 = vld [vmem:[%s1186_s5 + $0x260] sm:$0xff] }
  0xa5   :  { %385 = vmatpush.msra.mxu2 %v308_v3  ;;  %405 = vmatpush.msra.mxu3 %v324_v62  ;;  %v320_v3 = vld [vmem:[%s1186_s5 + $0x258] sm:$0xff]  ;;  %v430_v62 = vld [vmem:[%s1188_s6 + $0x8] sm:$0xff] }
  0xa6   :  { %366 = vmatpush.msra.mxu1 %v291_v5  ;;  %v266_v5 = vld [vmem:[%s1186_s5 + $0xa8] sm:$0xff] }
  0xa7   :  { %386 = vmatpush.msra.mxu2 %v307_v7  ;;  %406 = vmatpush.msra.mxu3 %v323_v0  ;;  %v298_v7 = vld [vmem:[%s1186_s5 + $0x1a8] sm:$0xff]  ;;  %v452_v0 = vld [vmem:[%s1188_s6 + $0xb8] sm:$0xff] }
  0xa8   :  { %367 = vmatpush.msra.mxu1 %v290_v9  ;;  %355 = vmatpush.msrb.mxu0 %v266_v5  ;;  %v265_v9 = vld [vmem:[%s1186_s5 + $0xa0] sm:$0xff]  ;;  %v443_v5 = vld [vmem:[%s1188_s6 + $0x70] sm:$0xff] }
  0xa9   :  { %387 = vmatpush.msra.mxu2 %v306_v10  ;;  %407 = vmatpush.msra.mxu3 %v322_v1  ;;  %v281_v10 = vld [vmem:[%s1186_s5 + $0x120] sm:$0xff] }
  0xaa   :  { %368 = vmatpush.msra.mxu1 %v289_v13  ;;  %356 = vmatpush.msrb.mxu0 %v265_v9  ;;  %v264_v13 = vld [vmem:[%s1186_s5 + $0x98] sm:$0xff]  ;;  %v453_v1 = vld [vmem:[%s1188_s6 + $0xc0] sm:$0xff] }
  0xab   :  { %575 = vmatmul.msk.f32.vlgmr.msrb.gmra.mxu1 %vm120_vm0, %v67_v60  ;;  %576 = vmatmul.msk.f32.vlgmr.msrb.gmra.mxu2 %vm120_vm0, %v67_v60 }
  0xac   :  { %388 = vmatpush.msra.mxu2 %v305_v14  ;;  %369 = vmatpush.msra.mxu1 %v288_v18  ;;  %v280_v14 = vld [vmem:[%s1186_s5 + $0x118] sm:$0xff]  ;;  %v279_v18 = vld [vmem:[%s1186_s5 + $0x110] sm:$0xff] }
  0xad   :  { %408 = vmatpush.msra.mxu3 %v321_v2  ;;  %357 = vmatpush.msrb.mxu0 %v264_v13  ;;  %v447_v2 = vld [vmem:[%s1188_s6 + $0x90] sm:$0xff] }
  0xae   :  { %389 = vmatpush.msra.mxu2 %v304_v19  ;;  %370 = vmatpush.msra.mxu1 %v287_v22  ;;  %v295_v19 = vld [vmem:[%s1186_s5 + $0x190] sm:$0xff]  ;;  %v278_v22 = vld [vmem:[%s1186_s5 + $0x108] sm:$0xff] }
  0xaf   :  { %409 = vmatpush.msra.mxu3 %v320_v3  ;;  %v448_v3 = vld [vmem:[%s1188_s6 + $0x98] sm:$0xff] }
  0xb0   :  { %390 = vmatpush.msra.mxu2 %v303_v23  ;;  %371 = vmatpush.msra.mxu1 %v286_v27  ;;  %v294_v23 = vld [vmem:[%s1186_s5 + $0x188] sm:$0xff]  ;;  %v293_v27 = vld [vmem:[%s1186_s5 + $0x180] sm:$0xff] }
  0xb1   :  { %410 = vmatpush.msra.mxu3 %v319_v4  ;;  %v442_v4 = vld [vmem:[%s1188_s6 + $0x68] sm:$0xff] }
  0xb2   :  { %391 = vmatpush.msra.mxu2 %v302_v28  ;;  %372 = vmatpush.msra.mxu1 %v285_v32  ;;  %v313_v28 = vld [vmem:[%s1186_s5 + $0x220] sm:$0xff] }
  0xb3   :  { %411 = vmatpush.msra.mxu3 %v318_v8  ;;  %v309_v32 = vld [vmem:[%s1186_s5 + $0x200] sm:$0xff] }
  0xb4   :  { %392 = vmatpush.msra.mxu2 %v301_v33  ;;  %373 = vmatpush.msra.mxu1 %v284_v36 }
  0xb5   :  { %412 = vmatpush.msra.mxu3 %v317_v12  ;;  %v433_v12 = vld [vmem:[%s1188_s6 + $0x20] sm:$0xff] }
  0xb6   :  { %393 = vmatpush.msra.mxu2 %v300_v37  ;;  %374 = vmatpush.msra.mxu1 %v283_v44 }
  0xb7   :  { %413 = vmatpush.msra.mxu3 %v316_v16 }
  0xb8   :  { %394 = vmatpush.msra.mxu2 %v299_v45  ;;  %375 = vmatpush.msra.mxu1 %v282_v6  ;;  %v437_v6 = vld [vmem:[%s1188_s6 + $0x40] sm:$0xff] }
  0xb9   :  { %414 = vmatpush.msra.mxu3 %v315_v20 }
  0xba   :  { %395 = vmatpush.msra.mxu2 %v298_v7  ;;  %376 = vmatpush.msra.mxu1 %v281_v10  ;;  %v438_v7 = vld [vmem:[%s1188_s6 + $0x48] sm:$0xff]  ;;  %v432_v10 = vld [vmem:[%s1188_s6 + $0x18] sm:$0xff] }
  0xbb   :  { %415 = vmatpush.msra.mxu3 %v314_v24 }
  0xbc   :  { %396 = vmatpush.msra.mxu2 %v297_v11  ;;  %377 = vmatpush.msra.mxu1 %v280_v14 }
  0xbd   :  { %416 = vmatpush.msra.mxu3 %v313_v28 }
  0xbe   :  { %397 = vmatpush.msra.mxu2 %v296_v15  ;;  %378 = vmatpush.msra.mxu1 %v279_v18 }
  0xbf   :  { %417 = vmatpush.msra.mxu3 %v312_v29 }
  0xc0   :  { %398 = vmatpush.msra.mxu2 %v295_v19  ;;  %379 = vmatpush.msra.mxu1 %v278_v22 }
  0xc1   :  { %418 = vmatpush.msra.mxu3 %v311_v30 }
  0xc2   :  { %399 = vmatpush.msra.mxu2 %v294_v23 }
  0xc3   :  { %419 = vmatpush.msra.mxu3 %v310_v31 }
  0xc4   :  { %400 = vmatpush.msra.mxu2 %v293_v27 }
  0xc5   :  { %420 = vmatpush.msra.mxu3 %v309_v32 }
 0x120   :  { %v141_v17 = vpop.f32.mrf.mxu1 }
 0x121   :  { %v941_v51 = vadd.f32 %v141_v17, %v110_v38  ;;  %v263_v17 = vld [vmem:[%s1186_s5 + $0x90] sm:$0xff] }
 0x122   :  { %358 = vmatpush.msrb.mxu0 %v263_v17 }
 0x124   :  { %359 = vmatpush.msrb.mxu0 %v262_v21 }
 0x126   :  { %v161_v26 = vpop.f32.mrf.mxu2  ;;  %360 = vmatpush.msrb.mxu0 %v261_v25 }
 0x127   :  { %v181_v49 = vpop.f32.mrf.mxu3  ;;  %v950_v55 = vadd.f32 %v161_v26, %v111_v46  ;;  %v277_v26 = vld [vmem:[%s1186_s5 + $0x100] sm:$0xff] }
 0x128   :  { %v201_v43 = vpop.f32.mrf.mxu1  ;;  %v952_v56 = vadd.f32 %v181_v49, %v112_v47  ;;  %380 = vmatpush.msra.mxu1 %v277_v26  ;;  %v449_v49 = vld [vmem:[%s1188_s6 + $0xa0] sm:$0xff] }
 0x129   :  { %v943_v52 = vadd.f32 %v201_v43, %v113_v39  ;;  %469 = vmatpush.msra.mxu0 %v449_v49 }
 0x12b   :  { %v226_v60 = vmax.f32 %v952_v56, %v943_v52 }
 0x12e   :  { %v221_v50 = vpop.f32.mrf.mxu2 }
 0x12f   :  { %v945_v53 = vadd.f32 %v221_v50, %v114_v40  ;;  %v450_v50 = vld [vmem:[%s1188_s6 + $0xa8] sm:$0xff] }
 0x130   :  { %489 = vmatpush.msrb.mxu1 %v450_v50 }
 0x131   :  { %v224_v57 = vmax.f32 %v941_v51, %v945_v53 }
 0x133   :  { %v225_v59 = vmax.f32 %v224_v57, %v950_v55  ;;  %v441_v57 = vld [vmem:[%s1188_s6 + $0x60] sm:$0xff] }
 0x135   :  { %v227_v63 = vmax.f32 %v225_v59, %v226_v60  ;;  %v435_v59 = vld [vmem:[%s1188_s6 + $0x30] sm:$0xff]  ;;  %v436_v60 = vld [vmem:[%s1188_s6 + $0x38] sm:$0xff] }
 0x137   :  { %228 = vmax.xlane.f32.xlu0 %v227_v63  ;;  %v431_v63 = vld [vmem:[%s1188_s6 + $0x10] sm:$0xff] }
 0x1aa   :  { %v229_v33 = vpop.xlane.xlu0 %228 }
 0x1ab   :  { %v1068_v34 = vsub.f32 %v941_v51, %v229_v33  ;;  %v1071_v35 = vsub.f32 %v950_v55, %v229_v33  ;;  %v1074_v36 = vsub.f32 %v952_v56, %v229_v33  ;;  %v1077_v37 = vsub.f32 %v943_v52, %v229_v33  ;;  %v451_v51 = vld [vmem:[%s1188_s6 + $0xb0] sm:$0xff]  ;;  %v444_v52 = vld [vmem:[%s1188_s6 + $0x78] sm:$0xff] }
 0x1ac   :  { %v1084_v42 = vsub.f32 %v945_v53, %v229_v33  ;;  %509 = vmatpush.msrb.mxu2 %v451_v51  ;;  %v445_v53 = vld [vmem:[%s1188_s6 + $0x80] sm:$0xff]  ;;  %470 = vmatpush.msra.mxu0 %v444_v52  ;;  %v439_v55 = vld [vmem:[%s1188_s6 + $0x50] sm:$0xff]  ;;  %v440_v56 = vld [vmem:[%s1188_s6 + $0x58] sm:$0xff] }
 0x1ad   :  { %v235_v38 = vmul.f32 1.442695, %v1068_v34  ;;  %v237_v39 = vmul.f32 1.442695, %v1071_v35  ;;  %v239_v40 = vmul.f32 1.442695, %v1074_v36  ;;  %490 = vmatpush.msrb.mxu1 %v445_v53 }
 0x1ae   :  { %v241_v41 = vmul.f32 1.442695, %v1077_v37  ;;  %v243_v43 = vmul.f32 1.442695, %v1084_v42  ;;  %510 = vmatpush.msrb.mxu2 %v446_v54  ;;  %471 = vmatpush.msra.mxu0 %v439_v55 }
 0x1af   :  { %583 = vpow2.f32 %v235_v38  ;;  %491 = vmatpush.msrb.mxu1 %v440_v56 }
 0x1b0   :  { %585 = vpow2.f32 %v237_v39  ;;  %511 = vmatpush.msrb.mxu2 %v441_v57  ;;  %472 = vmatpush.msra.mxu0 %v434_v58 }
 0x1b1   :  { %587 = vpow2.f32 %v239_v40  ;;  %492 = vmatpush.msrb.mxu1 %v435_v59 }
 0x1b2   :  { %589 = vpow2.f32 %v241_v41  ;;  %512 = vmatpush.msrb.mxu2 %v436_v60  ;;  %473 = vmatpush.msra.mxu0 %v429_v61 }
 0x1b3   :  { %591 = vpow2.f32 %v243_v43  ;;  %493 = vmatpush.msrb.mxu1 %v430_v62 }
 0x1b4   :  { %513 = vmatpush.msrb.mxu2 %v431_v63 }
 0x1b5   :  { %v584_v44 = vpop.eup %583 }
 0x1b6   :  { %v586_v45 = vpop.eup %585  ;;  %341 = vmatmul.f32.vlgmr.msrb.gmra.mxu3 %v584_v44 }
 0x1b7   :  { %v588_v46 = vpop.eup %587  ;;  %361 = vmatmul.f32.vlgmr.msrb.gmra.mxu0 %v586_v45 }
 0x1b8   :  { %v590_v47 = vpop.eup %589  ;;  %381 = vmatmul.f32.vlgmr.msra.gmra.mxu1 %v588_v46  ;;  %529 = vmatpush.msrb.mxu0 %v452_v0 }
 0x1b9   :  { %401 = vmatmul.f32.vlgmr.msra.gmra.mxu2 %v590_v47  ;;  %v592_v48 = vpop.eup %591  ;;  %549 = vmatpush.msra.mxu1 %v453_v1 }
 0x1ba   :  { %530 = vmatpush.msrb.mxu0 %v447_v2 }
 0x1bb   :  { %550 = vmatpush.msra.mxu1 %v448_v3 }
 0x1bc   :  { %531 = vmatpush.msrb.mxu0 %v442_v4 }
 0x1bd   :  { %551 = vmatpush.msra.mxu1 %v443_v5 }
 0x1be   :  { %421 = vmatmul.f32.vlgmr.msra.gmra.mxu3 %v592_v48  ;;  %532 = vmatpush.msrb.mxu0 %v437_v6 }
 0x1bf   :  { %552 = vmatpush.msra.mxu1 %v438_v7 }
 0x1c0   :  { %533 = vmatpush.msrb.mxu0 %v432_v10 }
 0x1c1   :  { %553 = vmatpush.msra.mxu1 %v433_v12 }
 0x234   :  { %v362_v8 = vpop.f32.mrf.mxu0 }
 0x235   :  { %v382_v13 = vpop.f32.mrf.mxu1 }
 0x239   :  { %v342_v9 = vpop.f32.mrf.mxu3 }
 0x23a   :  { %v363_v11 = vadd.f32 %v362_v8, %v342_v9 }
 0x23c   :  { %v383_v14 = vadd.f32 %v382_v13, %v363_v11  ;;  %v402_v15 = vpop.f32.mrf.mxu2 }
 0x23e   :  { %v403_v16 = vadd.f32 %v402_v15, %v383_v14 }
 0x241   :  { %v422_v17 = vpop.f32.mrf.mxu3 }
 0x242   :  { %v423_v18 = vadd.f32 %v422_v17, %v403_v16 }
 0x244   :  { %v425_v19 = vmax.f32 %v423_v18, 1e-37 }
 0x246   :  { %593 = vlog2.f32 %v425_v19 }
 0x24c   :  { %v594_v20 = vpop.eup %593 }
 0x24d   :  { %v427_v21 = vmul.f32 0.6931472, %v594_v20 }
 0x24f   :  { %v428_v22 = vsub.f32 0.0, %v427_v21 }
 0x251   :  { %577 = vmatmul.msk.f32.vlgmr.msra.gmra.mxu0 %vm454_vm1, %v428_v22  ;;  %578 = vmatmul.msk.f32.vlgmr.msrb.gmra.mxu1 %vm454_vm1, %v428_v22 }
 0x252   :  { %579 = vmatmul.msk.f32.vlgmr.msrb.gmra.mxu2 %vm454_vm1, %v428_v22 }
 0x259   :  { %580 = vmatmul.msk.f32.vlgmr.msrb.gmra.mxu0 %vm454_vm1, %v428_v22  ;;  %581 = vmatmul.msk.f32.vlgmr.msra.gmra.mxu1 %vm454_vm1, %v428_v22 }
 0x2ce   :  { %v475_v23 = vpop.f32.mrf.mxu0  ;;  %v495_v24 = vpop.f32.mrf.mxu1 }
 0x2cf   :  { %v558_v25 = vadd.f32 %v475_v23, %v1068_v34  ;;  %v559_v26 = vadd.f32 %v495_v24, %v1071_v35 }
 0x2d1   :  { %563 = vst [vmem:[%s1189_s7] sm:$0xff] %v558_v25 }
 0x2d2   :  { %564 = vst [vmem:[%s1189_s7 + $0x8] sm:$0xff] %v559_v26 }
 0x2d5   :  { %v515_v27 = vpop.f32.mrf.mxu2 }
 0x2d6   :  { %v560_v28 = vadd.f32 %v515_v27, %v1074_v36  ;;  %v535_v29 = vpop.f32.mrf.mxu0  ;;  %v555_v30 = vpop.f32.mrf.mxu1 }
 0x2d7   :  { %v561_v31 = vadd.f32 %v535_v29, %v1077_v37  ;;  %v562_v32 = vadd.f32 %v555_v30, %v1084_v42 }
 0x2d8   :  { %565 = vst [vmem:[%s1189_s7 + $0x10] sm:$0xff] %v560_v28 }
 0x2d9   :  { %566 = vst [vmem:[%s1189_s7 + $0x18] sm:$0xff] %v561_v31 }
 0x2da   :  { %567 = vst [vmem:[%s1189_s7 + $0x20] sm:$0xff] %v562_v32 }

</bundles_post_ra>
